<compile_context>
chip_gen: v7x
topology: tpu7x:2x2x1
jax: 0.10.0
libtpu: 0.0.40
codegen_flags: <defaults>
</compile_context>

<pallas_src>
import functools

import jax
import jax.numpy as jnp
import numpy as np
from jax.experimental import pallas as pl
from jax.experimental.pallas import tpu as pltpu


def _attention_kernel(x_ref, y_ref, bias_ref,
                      wq_ref, wk_ref, wv_ref, wo_ref,
                      o_ref,
                      *, num_heads: int, depth: int):
    """One grid step == (one batch element, one tile of query rows).

    x_ref    : (1, TQ, H)  VMEM  query tile, native dtype
    y_ref    : (1, Ly, H)  VMEM  key/value input, native dtype
    bias_ref : (1, 1, Ly)  VMEM  un-broadcast attention bias row (f32)
    w*_ref   : (H, H)      VMEM  transposed Linear weights (in -> out), native dtype
    o_ref    : (1, TQ, H)  VMEM  output tile
    """
    dtype = x_ref.dtype
    x = x_ref[0]                                   # (TQ, H)
    y = y_ref[0]                                   # (Ly, H)

    # Projections on the MXU in the native dtype, f32 accumulation.
    q = jnp.dot(x, wq_ref[...], preferred_element_type=jnp.float32)   # (TQ, H) f32
    k = jnp.dot(y, wk_ref[...], preferred_element_type=jnp.float32)   # (Ly, H) f32
    v = jnp.dot(y, wv_ref[...], preferred_element_type=jnp.float32)   # (Ly, H) f32

    scale = jnp.float32(depth ** -0.5)
    # Cast projections back to the input dtype (matches PyTorch Linear outputs,
    # and keeps the per-head MXU matmuls in bf16 when the inputs are bf16).
    q = (q * scale).astype(dtype)
    k = k.astype(dtype)
    v = v.astype(dtype)

    bias_row = bias_ref[0].astype(jnp.float32)     # (1, Ly); broadcast in-vreg below

    # Per-head attention; fold the output projection into a per-head accumulation
    # so we never do sub-128-lane stores or re-load a combined-heads scratch.
    out_acc = jnp.zeros(o_ref.shape[1:], dtype=jnp.float32)            # (TQ, H)
    for h in range(num_heads):
        lo = h * depth
        qh = q[:, lo:lo + depth]                   # (TQ, d)
        kh = k[:, lo:lo + depth]                   # (Ly, d)
        vh = v[:, lo:lo + depth]                   # (Ly, d)

        logits = jnp.dot(qh, kh.T, preferred_element_type=jnp.float32)  # (TQ, Ly) f32
        logits = logits + bias_row                 # broadcast over query rows

        # _float32_softmax: softmax in float32, weights cast back to input dtype.
        m = jnp.max(logits, axis=-1, keepdims=True)
        e = jnp.exp(logits - m)
        p = e * pl.reciprocal(jnp.sum(e, axis=-1, keepdims=True), approx=True)
        p = p.astype(dtype)

        outh = jnp.dot(p, vh, preferred_element_type=jnp.float32).astype(dtype)  # (TQ, d)
        # combine_heads + output Linear == sum_h out_h @ Wo^T[lo:lo+d, :]
        out_acc = out_acc + jnp.dot(outh, wo_ref[lo:lo + depth, :],
                                    preferred_element_type=jnp.float32)

    o_ref[0] = out_acc.astype(o_ref.dtype)         # single lane-dense store


def attention_forward(x, y, bias, wq, wk, wv, wo, *,
                      num_heads: int, q_tile: int | None = None):
    """Pallas equivalent of Attention.forward (training=False, cache=None).

    x    : [B, Lx, H]
    y    : [B, Ly, H]
    bias : broadcastable to [B, 1, 1, Ly] (padding-mask style bias)
    wq, wk, wv, wo : PyTorch Linear weights, shape [H, H] (out_features, in_features).
    """
    B, Lx, H = x.shape
    Ly = y.shape[1]
    assert H % num_heads == 0
    depth = H // num_heads

    # Keep the bias un-broadcast in HBM: only flatten the (cheap) singleton axes.
    # TODO(synk): per-head or per-query biases (e.g. a [1,1,Lx,Lx] causal mask) would
    # need a (1, nh, TQ, Ly) bias block + matching index_map instead of this fast path.
    bias3d = jnp.broadcast_to(bias, (B, 1, 1, Ly)).reshape(B, 1, Ly).astype(jnp.float32)

    # PyTorch Linear stores W as [out, in]; kernel consumes W^T ([in, out]).
    wq_t, wk_t, wv_t, wo_t = (jnp.transpose(w) for w in (wq, wk, wv, wo))

    if q_tile is None:
        q_tile = Lx if Lx <= 256 else 256          # bounded VMEM working set for long Lx
    n_q = pl.cdiv(Lx, q_tile)

    kernel = functools.partial(_attention_kernel, num_heads=num_heads, depth=depth)

    # TODO(synk): for very long Ly a flash-style Ly grid axis (online softmax,
    # "arbitrary" semantics) would bound the (Ly, H) K/V tiles as well.
    return pl.pallas_call(
        kernel,
        out_shape=jax.ShapeDtypeStruct((B, Lx, H), x.dtype),
        grid_spec=pltpu.PrefetchScalarGridSpec(
            num_scalar_prefetch=0,
            grid=(B, n_q),
            in_specs=[
                pl.BlockSpec((1, q_tile, H), lambda b, qi: (b, qi, 0)),   # x tile
                pl.BlockSpec((1, Ly, H),     lambda b, qi: (b, 0, 0)),    # y (full K/V side)
                pl.BlockSpec((1, 1, Ly),     lambda b, qi: (b, 0, 0)),    # bias row (no nh/Lx blow-up)
                # Constant index_map -> the pipeline never re-fetches the weights.
                pl.BlockSpec((H, H), lambda b, qi: (0, 0)),               # Wq^T
                pl.BlockSpec((H, H), lambda b, qi: (0, 0)),               # Wk^T
                pl.BlockSpec((H, H), lambda b, qi: (0, 0)),               # Wv^T
                pl.BlockSpec((H, H), lambda b, qi: (0, 0)),               # Wo^T
            ],
            out_specs=pl.BlockSpec((1, q_tile, H), lambda b, qi: (b, qi, 0)),
        ),
        compiler_params=pltpu.CompilerParams(
            dimension_semantics=("parallel", "parallel")),
    )(x, y, bias3d, wq_t, wk_t, wv_t, wo_t)


def attention_reference(x, y, bias, wq, wk, wv, wo, *, num_heads: int):
    """Pure-JAX reference mirroring the PyTorch forward exactly."""
    B, Lx, H = x.shape
    depth = H // num_heads
    q = x @ wq.T
    k = y @ wk.T
    v = y @ wv.T

    def split(t):
        Bq, L, _ = t.shape
        return jnp.transpose(t.reshape(Bq, L, num_heads, depth), (0, 2, 1, 3))

    q, k, v = split(q), split(k), split(v)
    q = q * (depth ** -0.5)
    logits = jnp.einsum("bhqd,bhkd->bhqk", q, k) + bias
    weights = jax.nn.softmax(logits.astype(jnp.float32), axis=-1).astype(logits.dtype)
    attn = jnp.einsum("bhqk,bhkd->bhqd", weights, v)
    attn = jnp.transpose(attn, (0, 2, 1, 3)).reshape(B, Lx, H)
    return attn @ wo.T


if __name__ == "__main__":
    B, Lx, Ly, H, NH = 2, 8, 8, 32, 4

    key = jax.random.PRNGKey(0)
    kx, ky, kb, k1, k2, k3, k4 = jax.random.split(key, 7)

    x = jax.random.normal(kx, (B, Lx, H), dtype=jnp.float32)
    y = jax.random.normal(ky, (B, Ly, H), dtype=jnp.float32)
    # Typical transformer padding-mask style bias: [B, 1, 1, Ly].
    bias = jnp.where(jax.random.uniform(kb, (B, 1, 1, Ly)) > 0.8, -1e9, 0.0).astype(jnp.float32)

    # Deterministic "Linear" weights, PyTorch layout [out_features, in_features].
    s = 1.0 / np.sqrt(H)
    wq = jax.random.uniform(k1, (H, H), minval=-s, maxval=s, dtype=jnp.float32)
    wk = jax.random.uniform(k2, (H, H), minval=-s, maxval=s, dtype=jnp.float32)
    wv = jax.random.uniform(k3, (H, H), minval=-s, maxval=s, dtype=jnp.float32)
    wo = jax.random.uniform(k4, (H, H), minval=-s, maxval=s, dtype=jnp.float32)

    # TODO(synk): decode-time `cache` concat path not implemented (prediction-only feature);
    # attention_dropout is unused in the reference forward, so it is omitted here too.
    out = attention_forward(x, y, bias, wq, wk, wv, wo, num_heads=NH)
    out = jax.block_until_ready(out)

    ref = attention_reference(x, y, bias, wq, wk, wv, wo, num_heads=NH)
    # Tolerance accounts for pl.reciprocal(approx=True) in the softmax denominator
    # (EUP vrcp, relative error ~1e-4); everything else is exact f32.
    np.testing.assert_allclose(np.asarray(out), np.asarray(ref), rtol=2e-3, atol=2e-3)

    print("KERNEL_OK")
</pallas_src>

<mosaic_0001>
module attributes {stable_mosaic.version = 11 : i64} {
  func.func @_attention_kernel(%arg0: i32, %arg1: i32, %arg2: memref<1x8x32xf32, #tpu.memory_space<vmem>>, %arg3: memref<1x8x32xf32, #tpu.memory_space<vmem>>, %arg4: memref<1x1x8xf32, #tpu.memory_space<vmem>>, %arg5: memref<32x32xf32, #tpu.memory_space<vmem>>, %arg6: memref<32x32xf32, #tpu.memory_space<vmem>>, %arg7: memref<32x32xf32, #tpu.memory_space<vmem>>, %arg8: memref<32x32xf32, #tpu.memory_space<vmem>>, %arg9: memref<1x8x32xf32, #tpu.memory_space<vmem>>) attributes {dimension_semantics = [#tpu.dimension_semantics<parallel>, #tpu.dimension_semantics<parallel>], iteration_bounds = array<i64: 2, 1>, scalar_prefetch = 0 : i64, scratch_operands = 0 : i64, tpu.core_type = #tpu.core_type<tc>, window_params = [{transform_indices = @transform_0, window_bounds = array<i64: 1, 8, 32>}, {transform_indices = @transform_1, window_bounds = array<i64: 1, 8, 32>}, {transform_indices = @transform_2, window_bounds = array<i64: 1, 1, 8>}, {pipeline_mode = #tpu.pipeline_mode<synchronous>, transform_indices = @transform_3, window_bounds = array<i64: 32, 32>}, {pipeline_mode = #tpu.pipeline_mode<synchronous>, transform_indices = @transform_4, window_bounds = array<i64: 32, 32>}, {pipeline_mode = #tpu.pipeline_mode<synchronous>, transform_indices = @transform_5, window_bounds = array<i64: 32, 32>}, {pipeline_mode = #tpu.pipeline_mode<synchronous>, transform_indices = @transform_6, window_bounds = array<i64: 32, 32>}, {transform_indices = @transform_7, window_bounds = array<i64: 1, 8, 32>}]} {
    %c0 = arith.constant 0 : index
    %c0_0 = arith.constant 0 : index
    %c0_1 = arith.constant 0 : index
    %0 = vector.load %arg2[%c0, %c0_0, %c0_1] : memref<1x8x32xf32, #tpu.memory_space<vmem>>, vector<1x8x32xf32>
    %1 = vector.shape_cast %0 : vector<1x8x32xf32> to vector<8x32xf32>
    %c0_2 = arith.constant 0 : index
    %c0_3 = arith.constant 0 : index
    %c0_4 = arith.constant 0 : index
    %2 = vector.load %arg3[%c0_2, %c0_3, %c0_4] : memref<1x8x32xf32, #tpu.memory_space<vmem>>, vector<1x8x32xf32>
    %3 = vector.shape_cast %2 : vector<1x8x32xf32> to vector<8x32xf32>
    %c0_5 = arith.constant 0 : index
    %c0_6 = arith.constant 0 : index
    %4 = vector.load %arg5[%c0_5, %c0_6] : memref<32x32xf32, #tpu.memory_space<vmem>>, vector<32x32xf32>
    %cst = arith.constant dense<0.000000e+00> : vector<8x32xf32>
    %5 = tpu.matmul %1, %4, %cst {dimension_numbers = #tpu.dot_dimension_numbers<[1], [0], [0], [1], [0, 0, 1, 1], [], []>} : vector<8x32xf32>, vector<32x32xf32>, vector<8x32xf32> -> vector<8x32xf32>
    %c0_7 = arith.constant 0 : index
    %c0_8 = arith.constant 0 : index
    %6 = vector.load %arg6[%c0_7, %c0_8] : memref<32x32xf32, #tpu.memory_space<vmem>>, vector<32x32xf32>
    %cst_9 = arith.constant dense<0.000000e+00> : vector<8x32xf32>
    %7 = tpu.matmul %3, %6, %cst_9 {dimension_numbers = #tpu.dot_dimension_numbers<[1], [0], [0], [1], [0, 0, 1, 1], [], []>} : vector<8x32xf32>, vector<32x32xf32>, vector<8x32xf32> -> vector<8x32xf32>
    %c0_10 = arith.constant 0 : index
    %c0_11 = arith.constant 0 : index
    %8 = vector.load %arg7[%c0_10, %c0_11] : memref<32x32xf32, #tpu.memory_space<vmem>>, vector<32x32xf32>
    %cst_12 = arith.constant dense<0.000000e+00> : vector<8x32xf32>
    %9 = tpu.matmul %3, %8, %cst_12 {dimension_numbers = #tpu.dot_dimension_numbers<[1], [0], [0], [1], [0, 0, 1, 1], [], []>} : vector<8x32xf32>, vector<32x32xf32>, vector<8x32xf32> -> vector<8x32xf32>
    %cst_13 = arith.constant 0.353553385 : f32
    %10 = vector.broadcast %cst_13 : f32 to vector<8x32xf32>
    %11 = arith.mulf %5, %10 : vector<8x32xf32>
    %c0_14 = arith.constant 0 : index
    %c0_15 = arith.constant 0 : index
    %c0_16 = arith.constant 0 : index
    %12 = vector.load %arg4[%c0_14, %c0_15, %c0_16] : memref<1x1x8xf32, #tpu.memory_space<vmem>>, vector<1x1x8xf32>
    %13 = vector.shape_cast %12 : vector<1x1x8xf32> to vector<1x8xf32>
    %cst_17 = arith.constant 0.000000e+00 : f32
    %14 = vector.broadcast %cst_17 : f32 to vector<8x32xf32>
    %15 = vector.extract_strided_slice %11 {offsets = [0, 0], sizes = [8, 8], strides = [1, 1]} : vector<8x32xf32> to vector<8x8xf32>
    %16 = vector.extract_strided_slice %7 {offsets = [0, 0], sizes = [8, 8], strides = [1, 1]} : vector<8x32xf32> to vector<8x8xf32>
    %17 = vector.extract_strided_slice %9 {offsets = [0, 0], sizes = [8, 8], strides = [1, 1]} : vector<8x32xf32> to vector<8x8xf32>
    %18 = tpu.transpose %16, [1, 0] : vector<8x8xf32> -> vector<8x8xf32>
    %cst_18 = arith.constant dense<0.000000e+00> : vector<8x8xf32>
    %19 = tpu.matmul %15, %18, %cst_18 {dimension_numbers = #tpu.dot_dimension_numbers<[1], [0], [0], [1], [0, 0, 1, 1], [], []>} : vector<8x8xf32>, vector<8x8xf32>, vector<8x8xf32> -> vector<8x8xf32>
    %20 = vector.broadcast %13 : vector<1x8xf32> to vector<8x8xf32>
    %21 = arith.addf %19, %20 : vector<8x8xf32>
    %cst_19 = arith.constant dense<0xFF800000> : vector<8xf32>
    %22 = vector.multi_reduction <maximumf>, %21, %cst_19 [1] : vector<8x8xf32> to vector<8xf32>
    %23 = vector.shape_cast %22 : vector<8xf32> to vector<8x1xf32>
    %24 = vector.broadcast %23 : vector<8x1xf32> to vector<8x8xf32>
    %25 = arith.subf %21, %24 : vector<8x8xf32>
    %26 = math.exp %25 : vector<8x8xf32>
    %cst_20 = arith.constant dense<0.000000e+00> : vector<8xf32>
    %27 = vector.multi_reduction <add>, %26, %cst_20 [1] : vector<8x8xf32> to vector<8xf32>
    %28 = vector.shape_cast %27 : vector<8xf32> to vector<8x1xf32>
    %29 = tpu.reciprocal %28 {approx = true} : vector<8x1xf32> -> vector<8x1xf32>
    %30 = vector.broadcast %29 : vector<8x1xf32> to vector<8x8xf32>
    %31 = arith.mulf %26, %30 : vector<8x8xf32>
    %cst_21 = arith.constant dense<0.000000e+00> : vector<8x8xf32>
    %32 = tpu.matmul %31, %17, %cst_21 {dimension_numbers = #tpu.dot_dimension_numbers<[1], [0], [0], [1], [0, 0, 1, 1], [], []>} : vector<8x8xf32>, vector<8x8xf32>, vector<8x8xf32> -> vector<8x8xf32>
    %c0_22 = arith.constant 0 : index
    %c0_23 = arith.constant 0 : index
    %33 = vector.load %arg8[%c0_22, %c0_23] : memref<32x32xf32, #tpu.memory_space<vmem>>, vector<8x32xf32>
    %cst_24 = arith.constant dense<0.000000e+00> : vector<8x32xf32>
    %34 = tpu.matmul %32, %33, %cst_24 {dimension_numbers = #tpu.dot_dimension_numbers<[1], [0], [0], [1], [0, 0, 1, 1], [], []>} : vector<8x8xf32>, vector<8x32xf32>, vector<8x32xf32> -> vector<8x32xf32>
    %35 = arith.addf %14, %34 : vector<8x32xf32>
    %36 = vector.extract_strided_slice %11 {offsets = [0, 8], sizes = [8, 8], strides = [1, 1]} : vector<8x32xf32> to vector<8x8xf32>
    %37 = vector.extract_strided_slice %7 {offsets = [0, 8], sizes = [8, 8], strides = [1, 1]} : vector<8x32xf32> to vector<8x8xf32>
    %38 = vector.extract_strided_slice %9 {offsets = [0, 8], sizes = [8, 8], strides = [1, 1]} : vector<8x32xf32> to vector<8x8xf32>
    %39 = tpu.transpose %37, [1, 0] : vector<8x8xf32> -> vector<8x8xf32>
    %cst_25 = arith.constant dense<0.000000e+00> : vector<8x8xf32>
    %40 = tpu.matmul %36, %39, %cst_25 {dimension_numbers = #tpu.dot_dimension_numbers<[1], [0], [0], [1], [0, 0, 1, 1], [], []>} : vector<8x8xf32>, vector<8x8xf32>, vector<8x8xf32> -> vector<8x8xf32>
    %41 = vector.broadcast %13 : vector<1x8xf32> to vector<8x8xf32>
    %42 = arith.addf %40, %41 : vector<8x8xf32>
    %cst_26 = arith.constant dense<0xFF800000> : vector<8xf32>
    %43 = vector.multi_reduction <maximumf>, %42, %cst_26 [1] : vector<8x8xf32> to vector<8xf32>
    %44 = vector.shape_cast %43 : vector<8xf32> to vector<8x1xf32>
    %45 = vector.broadcast %44 : vector<8x1xf32> to vector<8x8xf32>
    %46 = arith.subf %42, %45 : vector<8x8xf32>
    %47 = math.exp %46 : vector<8x8xf32>
    %cst_27 = arith.constant dense<0.000000e+00> : vector<8xf32>
    %48 = vector.multi_reduction <add>, %47, %cst_27 [1] : vector<8x8xf32> to vector<8xf32>
    %49 = vector.shape_cast %48 : vector<8xf32> to vector<8x1xf32>
    %50 = tpu.reciprocal %49 {approx = true} : vector<8x1xf32> -> vector<8x1xf32>
    %51 = vector.broadcast %50 : vector<8x1xf32> to vector<8x8xf32>
    %52 = arith.mulf %47, %51 : vector<8x8xf32>
    %cst_28 = arith.constant dense<0.000000e+00> : vector<8x8xf32>
    %53 = tpu.matmul %52, %38, %cst_28 {dimension_numbers = #tpu.dot_dimension_numbers<[1], [0], [0], [1], [0, 0, 1, 1], [], []>} : vector<8x8xf32>, vector<8x8xf32>, vector<8x8xf32> -> vector<8x8xf32>
    %c8 = arith.constant 8 : index
    %c0_29 = arith.constant 0 : index
    %54 = vector.load %arg8[%c8, %c0_29] : memref<32x32xf32, #tpu.memory_space<vmem>>, vector<8x32xf32>
    %cst_30 = arith.constant dense<0.000000e+00> : vector<8x32xf32>
    %55 = tpu.matmul %53, %54, %cst_30 {dimension_numbers = #tpu.dot_dimension_numbers<[1], [0], [0], [1], [0, 0, 1, 1], [], []>} : vector<8x8xf32>, vector<8x32xf32>, vector<8x32xf32> -> vector<8x32xf32>
    %56 = arith.addf %35, %55 : vector<8x32xf32>
    %57 = vector.extract_strided_slice %11 {offsets = [0, 16], sizes = [8, 8], strides = [1, 1]} : vector<8x32xf32> to vector<8x8xf32>
    %58 = vector.extract_strided_slice %7 {offsets = [0, 16], sizes = [8, 8], strides = [1, 1]} : vector<8x32xf32> to vector<8x8xf32>
    %59 = vector.extract_strided_slice %9 {offsets = [0, 16], sizes = [8, 8], strides = [1, 1]} : vector<8x32xf32> to vector<8x8xf32>
    %60 = tpu.transpose %58, [1, 0] : vector<8x8xf32> -> vector<8x8xf32>
    %cst_31 = arith.constant dense<0.000000e+00> : vector<8x8xf32>
    %61 = tpu.matmul %57, %60, %cst_31 {dimension_numbers = #tpu.dot_dimension_numbers<[1], [0], [0], [1], [0, 0, 1, 1], [], []>} : vector<8x8xf32>, vector<8x8xf32>, vector<8x8xf32> -> vector<8x8xf32>
    %62 = vector.broadcast %13 : vector<1x8xf32> to vector<8x8xf32>
    %63 = arith.addf %61, %62 : vector<8x8xf32>
    %cst_32 = arith.constant dense<0xFF800000> : vector<8xf32>
    %64 = vector.multi_reduction <maximumf>, %63, %cst_32 [1] : vector<8x8xf32> to vector<8xf32>
    %65 = vector.shape_cast %64 : vector<8xf32> to vector<8x1xf32>
    %66 = vector.broadcast %65 : vector<8x1xf32> to vector<8x8xf32>
    %67 = arith.subf %63, %66 : vector<8x8xf32>
    %68 = math.exp %67 : vector<8x8xf32>
    %cst_33 = arith.constant dense<0.000000e+00> : vector<8xf32>
    %69 = vector.multi_reduction <add>, %68, %cst_33 [1] : vector<8x8xf32> to vector<8xf32>
    %70 = vector.shape_cast %69 : vector<8xf32> to vector<8x1xf32>
    %71 = tpu.reciprocal %70 {approx = true} : vector<8x1xf32> -> vector<8x1xf32>
    %72 = vector.broadcast %71 : vector<8x1xf32> to vector<8x8xf32>
    %73 = arith.mulf %68, %72 : vector<8x8xf32>
    %cst_34 = arith.constant dense<0.000000e+00> : vector<8x8xf32>
    %74 = tpu.matmul %73, %59, %cst_34 {dimension_numbers = #tpu.dot_dimension_numbers<[1], [0], [0], [1], [0, 0, 1, 1], [], []>} : vector<8x8xf32>, vector<8x8xf32>, vector<8x8xf32> -> vector<8x8xf32>
    %c16 = arith.constant 16 : index
    %c0_35 = arith.constant 0 : index
    %75 = vector.load %arg8[%c16, %c0_35] : memref<32x32xf32, #tpu.memory_space<vmem>>, vector<8x32xf32>
    %cst_36 = arith.constant dense<0.000000e+00> : vector<8x32xf32>
    %76 = tpu.matmul %74, %75, %cst_36 {dimension_numbers = #tpu.dot_dimension_numbers<[1], [0], [0], [1], [0, 0, 1, 1], [], []>} : vector<8x8xf32>, vector<8x32xf32>, vector<8x32xf32> -> vector<8x32xf32>
    %77 = arith.addf %56, %76 : vector<8x32xf32>
    %78 = vector.extract_strided_slice %11 {offsets = [0, 24], sizes = [8, 8], strides = [1, 1]} : vector<8x32xf32> to vector<8x8xf32>
    %79 = vector.extract_strided_slice %7 {offsets = [0, 24], sizes = [8, 8], strides = [1, 1]} : vector<8x32xf32> to vector<8x8xf32>
    %80 = vector.extract_strided_slice %9 {offsets = [0, 24], sizes = [8, 8], strides = [1, 1]} : vector<8x32xf32> to vector<8x8xf32>
    %81 = tpu.transpose %79, [1, 0] : vector<8x8xf32> -> vector<8x8xf32>
    %cst_37 = arith.constant dense<0.000000e+00> : vector<8x8xf32>
    %82 = tpu.matmul %78, %81, %cst_37 {dimension_numbers = #tpu.dot_dimension_numbers<[1], [0], [0], [1], [0, 0, 1, 1], [], []>} : vector<8x8xf32>, vector<8x8xf32>, vector<8x8xf32> -> vector<8x8xf32>
    %83 = vector.broadcast %13 : vector<1x8xf32> to vector<8x8xf32>
    %84 = arith.addf %82, %83 : vector<8x8xf32>
    %cst_38 = arith.constant dense<0xFF800000> : vector<8xf32>
    %85 = vector.multi_reduction <maximumf>, %84, %cst_38 [1] : vector<8x8xf32> to vector<8xf32>
    %86 = vector.shape_cast %85 : vector<8xf32> to vector<8x1xf32>
    %87 = vector.broadcast %86 : vector<8x1xf32> to vector<8x8xf32>
    %88 = arith.subf %84, %87 : vector<8x8xf32>
    %89 = math.exp %88 : vector<8x8xf32>
    %cst_39 = arith.constant dense<0.000000e+00> : vector<8xf32>
    %90 = vector.multi_reduction <add>, %89, %cst_39 [1] : vector<8x8xf32> to vector<8xf32>
    %91 = vector.shape_cast %90 : vector<8xf32> to vector<8x1xf32>
    %92 = tpu.reciprocal %91 {approx = true} : vector<8x1xf32> -> vector<8x1xf32>
    %93 = vector.broadcast %92 : vector<8x1xf32> to vector<8x8xf32>
    %94 = arith.mulf %89, %93 : vector<8x8xf32>
    %cst_40 = arith.constant dense<0.000000e+00> : vector<8x8xf32>
    %95 = tpu.matmul %94, %80, %cst_40 {dimension_numbers = #tpu.dot_dimension_numbers<[1], [0], [0], [1], [0, 0, 1, 1], [], []>} : vector<8x8xf32>, vector<8x8xf32>, vector<8x8xf32> -> vector<8x8xf32>
    %c24 = arith.constant 24 : index
    %c0_41 = arith.constant 0 : index
    %96 = vector.load %arg8[%c24, %c0_41] : memref<32x32xf32, #tpu.memory_space<vmem>>, vector<8x32xf32>
    %cst_42 = arith.constant dense<0.000000e+00> : vector<8x32xf32>
    %97 = tpu.matmul %95, %96, %cst_42 {dimension_numbers = #tpu.dot_dimension_numbers<[1], [0], [0], [1], [0, 0, 1, 1], [], []>} : vector<8x8xf32>, vector<8x32xf32>, vector<8x32xf32> -> vector<8x32xf32>
    %98 = arith.addf %77, %97 : vector<8x32xf32>
    %c0_43 = arith.constant 0 : index
    %c0_44 = arith.constant 0 : index
    %c0_45 = arith.constant 0 : index
    %99 = vector.load %arg9[%c0_43, %c0_44, %c0_45] : memref<1x8x32xf32, #tpu.memory_space<vmem>>, vector<1x8x32xf32>
    %100 = vector.shape_cast %99 : vector<1x8x32xf32> to vector<8x32xf32>
    %101 = vector.shape_cast %98 : vector<8x32xf32> to vector<1x8x32xf32>
    tpu.vector_store %arg9[%c0_43, %c0_44, %c0_45], %101 {strides = array<i32>} : memref<1x8x32xf32, #tpu.memory_space<vmem>>, vector<1x8x32xf32>,
    return
  }
  func.func @transform_0(%arg0: i32, %arg1: i32) -> (i32, i32, i32) {
    %c0_i32 = arith.constant 0 : i32
    %c0_i32_0 = arith.constant 0 : i32
    return %arg0, %arg1, %c0_i32 : i32, i32, i32
  }
  func.func @transform_1(%arg0: i32, %arg1: i32) -> (i32, i32, i32) {
    %c0_i32 = arith.constant 0 : i32
    %c0_i32_0 = arith.constant 0 : i32
    %c0_i32_1 = arith.constant 0 : i32
    return %arg0, %c0_i32, %c0_i32_0 : i32, i32, i32
  }
  func.func @transform_2(%arg0: i32, %arg1: i32) -> (i32, i32, i32) {
    %c0_i32 = arith.constant 0 : i32
    %c0_i32_0 = arith.constant 0 : i32
    %c0_i32_1 = arith.constant 0 : i32
    return %arg0, %c0_i32, %c0_i32_0 : i32, i32, i32
  }
  func.func @transform_3(%arg0: i32, %arg1: i32) -> (i32, i32) {
    %c0_i32 = arith.constant 0 : i32
    %c0_i32_0 = arith.constant 0 : i32
    %c0_i32_1 = arith.constant 0 : i32
    return %c0_i32, %c0_i32_0 : i32, i32
  }
  func.func @transform_4(%arg0: i32, %arg1: i32) -> (i32, i32) {
    %c0_i32 = arith.constant 0 : i32
    %c0_i32_0 = arith.constant 0 : i32
    %c0_i32_1 = arith.constant 0 : i32
    return %c0_i32, %c0_i32_0 : i32, i32
  }
  func.func @transform_5(%arg0: i32, %arg1: i32) -> (i32, i32) {
    %c0_i32 = arith.constant 0 : i32
    %c0_i32_0 = arith.constant 0 : i32
    %c0_i32_1 = arith.constant 0 : i32
    return %c0_i32, %c0_i32_0 : i32, i32
  }
  func.func @transform_6(%arg0: i32, %arg1: i32) -> (i32, i32) {
    %c0_i32 = arith.constant 0 : i32
    %c0_i32_0 = arith.constant 0 : i32
    %c0_i32_1 = arith.constant 0 : i32
    return %c0_i32, %c0_i32_0 : i32, i32
  }
  func.func @transform_7(%arg0: i32, %arg1: i32) -> (i32, i32, i32) {
    %c0_i32 = arith.constant 0 : i32
    %c0_i32_0 = arith.constant 0 : i32
    return %arg0, %arg1, %c0_i32 : i32, i32, i32
  }
}

</mosaic_0001>

<bundles_post_ra>
// kernel: tpu_custom_call.1
= control target key start
LH: loop header
LB: loop body
LE: loop exit
PB: predicated region body
PF: predicated region fallthrough
CT: control target
= control target key end

     0   :  { %s2894_s0 = inlined_call_operand.hbm [shape: f32[2,8,32], index: 0, kind: input, shape index: {}]   ;;  %s2895_s1 = inlined_call_operand.hbm [shape: f32[2,8,32], index: 1, kind: input, shape index: {}]   ;;  %s2896_s2 = inlined_call_operand.vmem [shape: f32[2,1,8], index: 2, kind: input, shape index: {}]   ;;  %s2897_s3 = inlined_call_operand.hbm [shape: f32[32,32], index: 3, kind: input, shape index: {}]   ;;  %s2898_s4 = inlined_call_operand.hbm [shape: f32[32,32], index: 4, kind: input, shape index: {}]   ;;  %s2899_s5 = inlined_call_operand.hbm [shape: f32[32,32], index: 5, kind: input, shape index: {}]   ;;  %s2900_s6 = inlined_call_operand.hbm [shape: f32[32,32], index: 6, kind: input, shape index: {}]   ;;  %s2901_s7 = inlined_call_operand.hbm [shape: f32[2,8,32], index: 7, kind: output, shape index: {}]  }
   0x1   :  { %2908 = sst [smem:[#allocation21_spill]] %s2897_s3 }
   0x2   :  { %2909 = sst [smem:[#allocation22_spill]] %s2898_s4 }
   0x3   :  { %2910 = sst [smem:[#allocation23_spill]] %s2899_s5 }
   0x4   :  { %2911 = sst [smem:[#allocation24_spill]] %s2900_s6 }
   0x5   :  { %2912 = sst [smem:[#allocation25_spill]] %s2901_s7 }
   0x6   :  { %12 = vsyncpa [#allocation3], 0 }
   0x7   :  { %14 = vsyncpa [#allocation3 + $0x1], 0 }
   0x8   :  { %15 = vsyncpa [#allocation6], 0 }
   0x9   :  { %17 = vsyncpa [#allocation6 + $0x1], 0 }
   0xa   :  { %18 = vsyncpa [#allocation9], 0 }
   0xb   :  { %19 = vsyncpa [#allocation12], 0 }
   0xc   :  { %20 = vsyncpa [#allocation4], 0 }
   0xd   :  { %22 = vsyncpa [#allocation4 + $0x1], 0  ;;  %s2439_s24 = smov 0   ;;  %s2441_s25 = smov 0  }
   0xe   :  { %s2443_s26 = smov 0   ;;  %s2445_s27 = smov 0  }
   0xf   :  { %s2447_s28 = smov 0   ;;  %s2449_s29 = smov 0  }
  0x10 LB: > { %s2470_s30 = sadd.s32 4294967295, %s2382_s29   ;;  %p1782_p0 = scmp.ge.s32.totalorder %s2382_s29, 1  ;;  %s2382_s29 = sphi %s2449_s29, %s28_s29   ;;  %s2378_s28 = sphi %s2447_s28, %s2944_s28   ;;  %s2374_s27 = sphi %s2445_s27, %s2943_s27   ;;  %s2370_s26 = sphi %s2443_s26, %s2942_s26   ;;  %s2366_s25 = sphi %s2441_s25, %s2941_s25   ;;  %s2362_s24 = sphi %s2439_s24, %s2940_s24  }
  0x11   : > { %p2903_p1 = scmp.eq.s32.totalorder %s2470_s30, 0  ;;  %p237_p2 = scmp.lt.s32.totalorder %s2382_s29, 3 }
  0x12   : > { %s2384_s9 = smov [#allocation7]   ;;  %s2385_s12 = smov [#allocation8]  }
  0x13   : > { %p2475_p3 = pnand %p1782_p0, %p237_p2  ;;  %s249_s10 = sshll.u32 %s2384_s9, 4  ;;  %s2479_s10 = int_to_ptr.vmem [resolvable:$true] %s249_s10 }
  0x14   : > { %s262_s13 = sshll.u32 %s2385_s12, 4  ;;  %s2386_s14 = smov [#allocation10]   ;;  %s2490_s13 = int_to_ptr.vmem [resolvable:$true] %s262_s13 }
  0x15   : > { %s2913_s8 = scalar_select %p2475_p3, 1, 0 }
  0x16   : > { %p2002_p4 = pneg %p2475_p3  ;;  %s2492_s15 = sshll.u32 %s2386_s14, 4  ;;  %s276_s15 = int_to_ptr.vmem [resolvable:$true] %s2492_s15 }
  0x17   : > { %s2915_s3 = sld [smem:[#allocation21_spill]] }
  0x18   : > { %p2486_p6 = pnand %p2002_p4, %p2903_p1 }
  0x1a   : > { %p2502_p8 = pneg %p2486_p6 }
  0x1d   : > { %s2112_s18 = scalar_lea.hbm %s2915_s3, 512 }
  0x1e   : > { %p2113_p7 = scmp.ne.s32.totalorder %s2915_s3, %s2112_s18  ;;  %p2119_p11 = scmp.lt.u32.totalorder %s2112_s18, %s2915_s3 }
  0x20   : > { %p2115_p9 = pnand %p2502_p8, %p2113_p7 }
  0x22   : > { %p2116_p10 = pneg %p2115_p9 }
  0x24   : > { %p2121_p12 = pnand %p2119_p11, %p2116_p10 }
  0x26   : > { %2124 = shalt.err (!%p2121_p12)
}
  0x27   : > { %s2125_s9 = scalar_lea.vmem %s2479_s10, 512  ;;  %p2133_p4 = scmp.lt.s32.totalorder %s2479_s10, %s2479_s10 }
  0x28   : > { %p2126_p13 = scmp.ne.s32.totalorder %s2479_s10, %s2125_s9  ;;  %p2134_p5 = scmp.lt.s32.totalorder %s2125_s9, %s2125_s9 }
  0x2a   : > { %p2128_p0 = pnand %p2126_p13, %p2502_p8  ;;  %p2135_p7 = por %p2134_p5, %p2133_p4 }
  0x2c   : > { %p2129_p2 = pneg %p2128_p0 }
  0x2e   : > { %p2136_p9 = pnand %p2135_p7, %p2129_p2 }
  0x30   : > { %2139 = shalt.err (!%p2136_p9)
}
  0x31   : > { %s2387_s12 = smov 128   ;;  %s2388_s14 = smov 8  }
  0x32   : > { %2005 = dma.hbm_to_vmem [thread:$0]  (!%p2486_p6), %s2915_s3, 512, %s2479_s10, [#allocation6], %s2387_s12, %s2387_s12, %s2388_s14  }
  0x33   : > { %s2917_s4 = sld [smem:[#allocation22_spill]] }
  0x39   : > { %s2140_s20 = scalar_lea.hbm %s2917_s4, 512 }
  0x3a   : > { %p2141_p5 = scmp.ne.s32.totalorder %s2917_s4, %s2140_s20  ;;  %p2147_p12 = scmp.lt.u32.totalorder %s2140_s20, %s2917_s4 }
  0x3c   : > { %p2143_p10 = pnand %p2141_p5, %p2502_p8 }
  0x3e   : > { %p2144_p11 = pneg %p2143_p10 }
  0x40   : > { %p2149_p13 = pnand %p2147_p12, %p2144_p11 }
  0x42   : > { %2152 = shalt.err (!%p2149_p13)
}
  0x43   : > { %s2153_s10 = scalar_lea.vmem %s2490_s13, 512  ;;  %p2161_p7 = scmp.lt.s32.totalorder %s2490_s13, %s2490_s13 }
  0x44   : > { %p2154_p0 = scmp.ne.s32.totalorder %s2490_s13, %s2153_s10  ;;  %p2162_p9 = scmp.lt.s32.totalorder %s2153_s10, %s2153_s10 }
  0x46   : > { %p2156_p2 = pnand %p2154_p0, %p2502_p8  ;;  %p2163_p5 = por %p2162_p9, %p2161_p7 }
  0x48   : > { %p2157_p4 = pneg %p2156_p2 }
  0x4a   : > { %p2164_p10 = pnand %p2163_p5, %p2157_p4 }
  0x4c   : > { %2167 = shalt.err (!%p2164_p10)
}
  0x4d   : > { %2008 = dma.hbm_to_vmem [thread:$0]  (!%p2486_p6), %s2917_s4, 512, %s2490_s13, [#allocation9], %s2387_s12, %s2387_s12, %s2388_s14  }
  0x4e   : > { %s2918_s5 = sld [smem:[#allocation23_spill]] }
  0x54   : > { %s2168_s19 = scalar_lea.hbm %s2918_s5, 512 }
  0x55   : > { %p2169_p11 = scmp.ne.s32.totalorder %s2918_s5, %s2168_s19  ;;  %p2175_p0 = scmp.lt.u32.totalorder %s2168_s19, %s2918_s5 }
  0x57   : > { %p2171_p12 = pnand %p2169_p11, %p2502_p8 }
  0x59   : > { %p2172_p13 = pneg %p2171_p12 }
  0x5b   : > { %p2177_p2 = pnand %p2175_p0, %p2172_p13 }
  0x5d   : > { %2180 = shalt.err (!%p2177_p2)
}
  0x5e   : > { %s2181_s10 = scalar_lea.vmem %s276_s15, 512  ;;  %p2189_p5 = scmp.lt.s32.totalorder %s276_s15, %s276_s15 }
  0x5f   : > { %p2182_p4 = scmp.ne.s32.totalorder %s276_s15, %s2181_s10  ;;  %p2190_p10 = scmp.lt.s32.totalorder %s2181_s10, %s2181_s10 }
  0x61   : > { %p2184_p7 = pnand %p2182_p4, %p2502_p8  ;;  %p2191_p1 = por %p2190_p10, %p2189_p5 }
  0x63   : > { %p2185_p9 = pneg %p2184_p7 }
  0x65   : > { %p2192_p3 = pnand %p2191_p1, %p2185_p9 }
  0x67   : > { %2195 = shalt.err (!%p2192_p3)
}
  0x68   : > { %2011 = dma.hbm_to_vmem [thread:$0]  (!%p2486_p6), %s2918_s5, 512, %s276_s15, [#allocation9], %s2387_s12, %s2387_s12, %s2388_s14  }
  0x69   : > { %s2389_s16 = smov [#allocation11]   ;;  %s2919_s6 = sld [smem:[#allocation24_spill]] }
  0x6a   : > { %s288_s17 = sshll.u32 %s2389_s16, 4  ;;  %s289_s17 = int_to_ptr.vmem [resolvable:$true] %s288_s17 }
  0x6f   : > { %s2196_s20 = scalar_lea.hbm %s2919_s6, 512 }
  0x70   : > { %p2197_p1 = scmp.ne.s32.totalorder %s2919_s6, %s2196_s20  ;;  %p2203_p12 = scmp.lt.u32.totalorder %s2196_s20, %s2919_s6 }
  0x72   : > { %p2199_p3 = pnand %p2197_p1, %p2502_p8 }
  0x74   : > { %p2200_p11 = pneg %p2199_p3 }
  0x76   : > { %p2205_p13 = pnand %p2203_p12, %p2200_p11 }
  0x78   : > { %2208 = shalt.err (!%p2205_p13)
}
  0x79   : > { %s2209_s15 = scalar_lea.vmem %s289_s17, 512  ;;  %p2217_p7 = scmp.lt.s32.totalorder %s289_s17, %s289_s17 }
  0x7a   : > { %p2210_p0 = scmp.ne.s32.totalorder %s289_s17, %s2209_s15  ;;  %p2218_p9 = scmp.lt.s32.totalorder %s2209_s15, %s2209_s15 }
  0x7c   : > { %p2212_p2 = pnand %p2210_p0, %p2502_p8  ;;  %p2219_p5 = por %p2218_p9, %p2217_p7 }
  0x7e   : > { %p2213_p4 = pneg %p2212_p2 }
  0x80   : > { %p2220_p10 = pnand %p2219_p5, %p2213_p4 }
  0x82   : > { %2223 = shalt.err (!%p2220_p10)
}
  0x83   : > { %2014 = dma.hbm_to_vmem [thread:$0]  (!%p2486_p6), %s2919_s6, 512, %s289_s17, [#allocation12], %s2387_s12, %s2387_s12, %s2388_s14  }
  0x84   : > { %s1781_s11 = sadd.s32 4294967294, %s2382_s29   ;;  %s40_s21 = sadd.s32 1, %s2378_s28 }
  0x85   : > { %p42_p8 = scmp.ge.s32.totalorder %s40_s21, 2  ;;  %s49_s16 = sadd.s32 1, %s2370_s26 }
  0x86   : > { %p56_p1 = scmp.ne.s32.totalorder %s2370_s26, %s2366_s25  ;;  %p57_p3 = scmp.eq.s32.totalorder %s2382_s29, 0 }
  0x87   : > { %s2946_s21 = smov (%p42_p8, %s40_s21), 0  ;;  %p62_p12 = scmp.ne.s32.totalorder %s2366_s25, %s2362_s24 }
  0x88   : > { %2920 = sst [smem:[#allocation20_spill]] %s2946_s21  ;;  %p2603_p11 = por %p57_p3, %p56_p1 }
  0x89   : > { %s44_s12 = ssub.s32 %s2378_s28, %s2946_s21  ;;  %p224_p6 = scmp.eq.s32.totalorder %s2470_s30, 1 }
  0x8a   : > { %p47_p13 = scmp.eq.s32.totalorder %s44_s12, 0  ;;  %p2922_p0 = scmp.eq.s32.totalorder %s2470_s30, 0 }
  0x8b   : > { %p2618_p4 = por %p224_p6, %p56_p1  ;;  %p230_p7 = scmp.eq.s32.totalorder %s1781_s11, 1 }
  0x8c   : > { %p2614_p2 = por %p2922_p0, %p62_p12  ;;  %p2030_p5 = scmp.lt.s32.totalorder %s2382_s29, 2 }
  0x8d   : > { %s2924_s17 = scalar_select %p2618_p4, 1, 0 }
  0x8e   : > { %s2923_s14 = scalar_select %p2614_p2, 1, 0 }
  0x8f   : > { %s2623_s19 = scalar_select %p47_p13, %s2370_s26, %s49_s16  }
  0x90   : > { %p2625_p9 = por %p230_p7, %p62_p12  ;;  %s302_s22 = sand.u32 1, %s2370_s26  }
  0x91   : > { %s1789_s23 = sshll.u32 %s2378_s28, 7  ;;  %s2632_s9 = sshll.u32 %s302_s22, 3 }
  0x92   : > { %s2925_s20 = scalar_select %p2625_p9, 1, 0 }
  0x93   : > { %s2637_s13 = scalar_lea.hbm %s2894_s0, %s1789_s23  ;;  %s306_s7 = scalar_lea.vmem [#allocation2], %s2632_s9 }
  0x94   : > { %s314_s11 = sshll.u32 %s306_s7, 4  ;;  %p2642_p10 = pnand %p2030_p5, %p2603_p11  ;;  %s2646_s11 = int_to_ptr.vmem [resolvable:$true] %s314_s11 }
  0x95   : > { %s2651_s15 = scalar_lea.hbm %s2895_s1, %s1789_s23  ;;  %s303_s3 = scalar_lea.sflag [#allocation3], %s302_s22 }
  0x96   : > { %s2224_s4 = scalar_lea.hbm %s2637_s13, 128  ;;  %p2226_p1 = pneg %p2642_p10 }
  0x97   : > { %p2225_p8 = scmp.ne.s32.totalorder %s2637_s13, %s2224_s4  ;;  %s2229_s5 = scalar_lea.hbm %s2894_s0, 256 }
  0x98   : > { %p2230_p12 = scmp.lt.u32.totalorder %s2637_s13, %s2894_s0  ;;  %p2231_p6 = scmp.lt.u32.totalorder %s2229_s5, %s2224_s4 }
  0x99   : > { %p2227_p3 = pnand %p2226_p1, %p2225_p8  ;;  %p2233_p0 = scmp.lt.u32.totalorder %s2224_s4, %s2637_s13 }
  0x9a   : > { %p2232_p13 = por %p2231_p6, %p2230_p12 }
  0x9b   : > { %p2228_p11 = pneg %p2227_p3 }
  0x9c   : > { %p2234_p7 = por %p2233_p0, %p2232_p13 }
  0x9e   : > { %p2235_p5 = pnand %p2234_p7, %p2228_p11 }
  0xa0   : > { %2238 = shalt.err (!%p2235_p5)
}
  0xa1   : > { %s2239_s22 = scalar_lea.vmem %s2646_s11, 128  ;;  %s2390_s23 = smov [#allocation2]  }
  0xa2   : > { %p2240_p8 = scmp.ne.s32.totalorder %s2646_s11, %s2239_s22  ;;  %s2244_s12 = sshll.u32 %s2390_s23, 4  ;;  %s2245_s12 = int_to_ptr.vmem [resolvable:$false] %s2244_s12 }
  0xa3   : > { %s2246_s6 = scalar_lea.vmem %s2245_s12, 256  ;;  %p2247_p4 = scmp.lt.s32.totalorder %s2646_s11, %s2245_s12 }
  0xa4   : > { %p2242_p3 = pnand %p2240_p8, %p2226_p1  ;;  %p2248_p12 = scmp.lt.s32.totalorder %s2246_s6, %s2239_s22 }
  0xa6   : > { %p2243_p9 = pneg %p2242_p3  ;;  %p2249_p6 = por %p2248_p12, %p2247_p4 }
  0xa8   : > { %p2250_p13 = pnand %p2249_p6, %p2243_p9 }
  0xaa   : > { %2253 = shalt.err (!%p2250_p13)
}
  0xab   : > { %2018 = dma.hbm_to_vmem [thread:$0]  (!%p2642_p10), %s2637_s13, 128, %s2646_s11, %s303_s3  }
  0xac   : > { %s321_s4 = sand.u32 1, %s2382_s29   ;;  %s325_s5 = scalar_lea.vmem [#allocation5], %s2632_s9 }
  0xad   : > { %s332_s21 = sshll.u32 %s325_s5, 4  ;;  %s322_s10 = scalar_lea.sflag [#allocation6], %s321_s4  ;;  %s333_s21 = int_to_ptr.vmem [resolvable:$true] %s332_s21 }
  0xae   : > { %s2254_s18 = scalar_lea.hbm %s2651_s15, 128  ;;  %s2259_s23 = scalar_lea.hbm %s2895_s1, 256 }
  0xaf   : > { %p2255_p4 = scmp.ne.s32.totalorder %s2651_s15, %s2254_s18  ;;  %p2260_p0 = scmp.lt.u32.totalorder %s2651_s15, %s2895_s1 }
  0xb0   : > { %p2261_p7 = scmp.lt.u32.totalorder %s2259_s23, %s2254_s18  ;;  %p2263_p8 = scmp.lt.u32.totalorder %s2254_s18, %s2651_s15 }
  0xb1   : > { %p2257_p9 = pnand %p2255_p4, %p2226_p1 }
  0xb2   : > { %p2262_p5 = por %p2261_p7, %p2260_p0 }
  0xb3   : > { %p2258_p11 = pneg %p2257_p9 }
  0xb4   : > { %p2264_p3 = por %p2263_p8, %p2262_p5 }
  0xb6   : > { %p2265_p12 = pnand %p2264_p3, %p2258_p11 }
  0xb8   : > { %2268 = shalt.err (!%p2265_p12)
}
  0xb9   : > { %s2269_s3 = scalar_lea.vmem %s333_s21, 128  ;;  %s2391_s9 = smov [#allocation5]  }
  0xba   : > { %p2270_p6 = scmp.ne.s32.totalorder %s333_s21, %s2269_s3  ;;  %s2274_s13 = sshll.u32 %s2391_s9, 4  ;;  %s2275_s13 = int_to_ptr.vmem [resolvable:$false] %s2274_s13 }
  0xbb   : > { %s2276_s11 = scalar_lea.vmem %s2275_s13, 256  ;;  %p2277_p9 = scmp.lt.s32.totalorder %s333_s21, %s2275_s13 }
  0xbc   : > { %p2272_p13 = pnand %p2270_p6, %p2226_p1  ;;  %p2278_p2 = scmp.lt.s32.totalorder %s2276_s11, %s2269_s3 }
  0xbe   : > { %p2273_p4 = pneg %p2272_p13  ;;  %p2279_p0 = por %p2278_p2, %p2277_p9 }
  0xc0   : > { %p2280_p7 = pnand %p2279_p0, %p2273_p4 }
  0xc2   : > { %2283 = shalt.err (!%p2280_p7)
}
  0xc3   : > { %2021 = dma.hbm_to_vmem [thread:$0]  (!%p2642_p10), %s2651_s15, 128, %s333_s21, %s322_s10  }
  0xc4   : > { %p2927_p11 = scmp.ne.s32.totalorder %s2913_s8, 0 }
  0xc5   : > { %s2702_s4 = sand.u32 (!%p2927_p11), 1, %s2366_s25   ;;  %p2928_p2 = scmp.ne.s32.totalorder (!%p2927_p11), %s2923_s14, 0 }
  0xc6   : > { %347 = sbr.rel (%p2927_p11) target bundleno = 3007 (0xbbf), region = 48  ;;  %s2705_s5 = sshll.u32 (!%p2927_p11), %s2702_s4, 3 }
  0xc7   : > { %s350_s18 = scalar_lea.sflag (!%p2927_p11), [#allocation3], %s2702_s4  ;;  %s353_s7 = scalar_lea.vmem (!%p2927_p11), [#allocation2], %s2705_s5 }
  0xcd   : > { %2337 = dma.done.wait (%p2928_p2), %s350_s18, 128  }
  0xce   : > { %2339 = vsyncadd (%p2928_p2), %s350_s18, 4294967168  ;;  %s358_s8 = sand.u32 1, %s2470_s30   ;;  %s362_s15 = scalar_lea.vmem [#allocation5], %s2705_s5 }
  0xcf   : > { %s359_s16 = scalar_lea.sflag [#allocation6], %s358_s8 }
  0xd0   : > { %2341 = dma.done.wait (%p2928_p2), %s359_s16, 128  }
  0xd1   : > { %2343 = vsyncadd (%p2928_p2), %s359_s16, 4294967168  ;;  %p2929_p10 = scmp.eq.s32.totalorder %s2470_s30, 0 }
  0xd3   : > { %2345 = dma.done.wait (%p2929_p10), [#allocation6], 512   ;;  %p2930_p1 = pmov %p2929_p10 }
  0xd5   : > { %2347 = vsyncadd (%p2930_p1), [#allocation6], 4294966784  ;;  %p2931_p5 = pmov %p2930_p1 }
  0xd6   : > { %p2932_p8 = pmov %p2930_p1 }
  0xd7   : > { %2349 = dma.done.wait (%p2931_p5), [#allocation9], 1024  }
  0xd8   : > { %2351 = vsyncadd (%p2932_p8), [#allocation9], 4294966272  ;;  %p2933_p3 = pmov %p2930_p1 }
  0xd9   : > { %p2934_p12 = pmov %p2930_p1 }
  0xda   : > { %2353 = dma.done.wait (%p2933_p3), [#allocation12], 512  }
  0xdb   : > { %2355 = vsyncadd (%p2934_p12), [#allocation12], 4294966784  ;;  %v2392_v0 = vmov 0.0|0.0   ;;  %vm2393_vm0 = vmmov 0   ;;  %v2394_v1 = vmov 0.0   ;;  %v500_v2 = vld [vmem:[#allocation8] sm:$0xff] }
  0xdc   : > { %1962 = vmatprep.subr.bf16.mxu1 %v2392_v0  ;;  %1956 = vmatprep.subr.bf16.mxu0 %v2392_v0  ;;  %v501_v3 = vld [vmem:[#allocation8 + $0x8] sm:$0xff]  ;;  %v422_v4 = vld [vmem:[#allocation7] sm:$0xff]  ;;  %v502_v7 = vld [vmem:[#allocation8 + $0x10] sm:$0xff]  ;;  %vm426_vm1 = vcmask 261120   ;;  %vm659_vm2 = vcmask 64512   ;;  %s2395_s30 = smov 120  }
  0xdd   : > { %1882 = vmatprep.mubr.msk.f32.mxu1 %vm2393_vm0, %v2394_v1  ;;  %1871 = vmatprep.mubr.msk.f32.mxu0 %vm2393_vm0, %v2394_v1  ;;  %v1963_v5 = vpack.c.bf16 %v501_v3, %v500_v2  ;;  %v423_v6 = vld [vmem:[#allocation7 + $0x8] sm:$0xff]  ;;  %v503_v8 = vld [vmem:[#allocation8 + $0x18] sm:$0xff]  ;;  %v424_v10 = vld [vmem:[#allocation7 + $0x10] sm:$0xff]  ;;  %p417_p6 = scmp.lt.s32.totalorder %s2374_s27, 1  ;;  %s2396_s23 = smov 112  }
  0xde   : > { %v1957_v9 = vpack.c.bf16 %v423_v6, %v422_v4  ;;  %v425_v11 = vld [vmem:[#allocation7 + $0x18] sm:$0xff]  ;;  %v1966_v12 = vpack.c.bf16 %v503_v8, %v502_v7  ;;  %v420_v15 = vld [vmem:[%s353_s7] sm:$0xff]  ;;  %v579_v23 = vld [vmem:[#allocation10 + $0x10] sm:$0xff]  ;;  %s2397_s12 = smov 104   ;;  %s1821_s6 = sshll.u32 %s2374_s27, 7 }
  0xdf   : > { %1964 = vmatpush3.bf16.msra.mxu1 %v1963_v5  ;;  %v1960_v13 = vpack.c.bf16 %v425_v11, %v424_v10  ;;  %v421_v14 = vld [vmem:[%s362_s15] sm:$0xff]  ;;  %v577_v21 = vld [vmem:[#allocation10] sm:$0xff]  ;;  %v578_v22 = vld [vmem:[#allocation10 + $0x8] sm:$0xff]  ;;  %s418_s14 = scalar_select %p417_p6, %s2374_s27, 1 }
  0xe0   : > { %1958 = vmatpush3.bf16.msra.mxu0 %v1957_v9  ;;  %1965 = vmatprep.subr.bf16.mxu1 %v2392_v0  ;;  %v1969_v24 = vpack.c.bf16 %v578_v22, %v577_v21  ;;  %v580_v25 = vld [vmem:[#allocation10 + $0x18] sm:$0xff]  ;;  %v987_v62 = vld [vmem:[#allocation11 + $0x8] sm:$0xff]  ;;  %v820_v63 = vld [vmem:[#allocation11] sm:$0xff]  ;;  %s416_s3 = scalar_lea.vmem [#allocation13], %s2705_s5  ;;  %s2935_s18 = sld [smem:[#allocation25_spill]] }
  0xe1   : > { %1959 = vmatprep.subr.bf16.mxu0 %v2392_v0  ;;  %v1972_v26 = vpack.c.bf16 %v580_v25, %v579_v23  ;;  %s419_s22 = scalar_lea.vmem %s2896_s2, %s418_s14  ;;  %s1630_s9 = sshll.u32 %s416_s3, 4  ;;  %s2846_s9 = int_to_ptr.vmem [resolvable:$true] %s1630_s9 }
  0xe2   : > { %v2770_v27 = vld [vmem:[%s419_s22] ss:$0 sm:$0xff]  ;;  %s1616_s8 = scalar_lea.sflag [#allocation4], %s2702_s4  ;;  %s2284_s16 = scalar_lea.vmem %s2846_s9, 128 }
  0xe3   : > { %1967 = vmatpush3.bf16.msra.mxu1 %v1966_v12  ;;  %p2285_p13 = scmp.ne.s32.totalorder %s2846_s9, %s2284_s16  ;;  %p2936_p4 = scmp.ne.s32.totalorder %s2924_s17, 0 }
  0xe4   : > { %1961 = vmatpush3.bf16.msra.mxu0 %v1960_v13  ;;  %1896 = vmatprep.subr.mxu1 %v2394_v1  ;;  %s2398_s27 = smov [#allocation13]  }
  0xe5   : > { %1968 = vmatprep.subr.bf16.mxu0 %v2392_v0  ;;  %p2286_p9 = pnand %p2285_p13, %p2936_p4  ;;  %s2288_s5 = sshll.u32 %s2398_s27, 4  ;;  %s2289_s5 = int_to_ptr.vmem [resolvable:$false] %s2288_s5 }
  0xe6   : > { %1883 = vmatmul.mubr.msk.f32.vlgmr.msra.gmra.mrb[0].mxu1 %vm426_vm1, %v421_v14  ;;  %s2844_s7 = scalar_lea.hbm %s2935_s18, %s1821_s6  ;;  %s2290_s15 = scalar_lea.vmem %s2289_s5, 256 }
  0xe7   : > { %1872 = vmatmul.mubr.msk.f32.vlgmr.msra.gmra.mrb[0].mxu0 %vm426_vm1, %v420_v15  ;;  %1898 = vmatprep.mubr.msk.f32.mxu1 %vm2393_vm0, %v2394_v1  ;;  %p2287_p0 = pneg %p2286_p9  ;;  %p2291_p7 = scmp.lt.s32.totalorder %s2846_s9, %s2289_s5 }
  0xe8   : > { %1893 = vmatprep.mubr.msk.f32.mxu0 %vm2393_vm0, %v2394_v1  ;;  %1970 = vmatpush3.bf16.msra.mxu0 %v1969_v24  ;;  %p2292_p11 = scmp.lt.s32.totalorder %s2290_s15, %s2284_s16 }
  0xe9   : > { %1971 = vmatprep.subr.bf16.mxu0 %v2392_v0 }
  0xea   : > { %p2293_p2 = por %p2292_p11, %p2291_p7 }
  0xec   : > { %1973 = vmatpush3.bf16.msra.mxu0 %v1972_v26  ;;  %p2294_p10 = pnand %p2293_p2, %p2287_p0 }
  0xed   : > { %1916 = vmatprep.subr.mxu0 %v2394_v1 }
  0xef   : > { %1894 = vmatmul.mubr.msk.f32.vlgmr.msra.gmra.mrb[2].mxu0 %vm426_vm1, %v421_v14 }
  0xf0   : > { %1918 = vmatprep.mubr.msk.f32.mxu0 %vm2393_vm0, %v2394_v1  ;;  %1917 = vmatpush3.msra.mxu0 %v987_v62 }
  0xf1   : > { %1921 = vmatprep.subr.mxu0 %v2394_v1 }
 0x1b9   : > { %v2746_v16 = vpop.f32.mrb[0].mxu1 }
 0x1ba   : > { %823 = vrot.lane.b32.xlu1 %v2746_v16, %s2395_s30  ;;  %v496_v17 = vpop.f32.mrb[0].mxu0  ;;  %v1884_v18 = vpop.f32.mrb[1].mxu1  ;;  %1897 = vmatpush3.xpose.msk.msra.mxu1 %vm659_vm2, %v2746_v16 }
 0x1bb   : > { %v2752_v19 = vmul.f32 0.35355338, %v496_v17  ;;  %v1873_v20 = vpop.f32.mrb[1].mxu0  ;;  %1901 = vmatprep.subr.mxu1 %v2394_v1  ;;  %v1299_v17 = vld [vmem:[#allocation11 + $0x10] sm:$0xff] }
 0x1bd   : > { %1899 = vmatmul.mubr.msk.f32.vlgmr.msra.gmra.mrb[2].mxu1 %vm659_vm2, %v2752_v19 }
 0x1be   : > { %821 = vrot.lane.b32.xlu1 %v2752_v19, %s2395_s30  ;;  %1903 = vmatprep.mubr.msk.f32.mxu1 %vm2393_vm0, %v2394_v1 }
 0x1c2   : > { %v2775_v37 = vpop.f32.mrb[2].mxu0 }
 0x1c3   : > { %v1895_v38 = vpop.f32.mrb[3].mxu0  ;;  %1902 = vmatpush3.msra.mxu1 %v2775_v37 }
 0x1c4   : > { %1906 = vmatprep.subr.mxu1 %v2394_v1 }
 0x22c   : > { %v824_v41 = vpop.permute.xlu1 %823 }
 0x230   : > { %v822_v43 = vpop.permute.xlu1 %821 }
 0x290   : > { %v732_v28 = vpop.f32.mrb[2].mxu1 }
 0x291   : > { %v733_v29 = vadd.f32 %v2770_v27, %v732_v28  ;;  %v1900_v30 = vpop.f32.mrb[3].mxu1 }
 0x293   : > { %v736_v31 = vsel %vm659_vm2, %v733_v29, -inf }
 0x294   : > { %737 = vmax.xlane.f32.xlu0 %v736_v31 }
 0x321   : > { %v738_v32 = vpop.xlane.xlu0 %737 }
 0x322   : > { %v739_v33 = vsub.f32 %v733_v29, %v738_v32 }
 0x324   : > { %v740_v34 = vmul.f32 1.442695, %v739_v33  ;;  %v1539_v33 = vld [vmem:[#allocation11 + $0x18] sm:$0xff] }
 0x326   : > { %2096 = vpow2.f32 %v740_v34 }
 0x330   : > { %v2097_v35 = vpop.eup %2096 }
 0x331   : > { %v742_v36 = vsel %vm659_vm2, %v2097_v35, 0.0 }
 0x332   : > { %743 = vadd.xlane.f32.xlu0 %v742_v36 }
 0x3bf   : > { %v744_v39 = vpop.xlane.xlu0 %743 }
 0x3c0   : > { %2098 = vrcp.f32 %v744_v39 }
 0x3ca   : > { %v2099_v40 = vpop.eup %2098 }
 0x3cb   : > { %v746_v42 = vmul.f32 %v2099_v40, %v2097_v35 }
 0x3cd   : > { %1904 = vmatmul.mubr.msk.f32.vlgmr.msra.gmra.mrb[4].mxu1 %vm659_vm2, %v746_v42 }
 0x3ce   : > { %1907 = vmatpush3.xpose.msk.msra.mxu1 %vm659_vm2, %v824_v41  ;;  %1908 = vmatprep.mubr.msk.f32.mxu1 %vm2393_vm0, %v2394_v1 }
 0x3cf   : > { %1911 = vmatprep.subr.mxu1 %v2394_v1 }
 0x3d1   : > { %1909 = vmatmul.mubr.msk.f32.vlgmr.msra.gmra.mrb[6].mxu1 %vm659_vm2, %v822_v43 }
 0x3d2   : > { %1913 = vmatprep.mubr.msk.f32.mxu1 %vm2393_vm0, %v2394_v1 }
 0x4a0   : > { %v816_v44 = vpop.f32.mrb[4].mxu1 }
 0x4a1   : > { %v1905_v45 = vpop.f32.mrb[5].mxu1 }
 0x4a4   : > { %v895_v46 = vpop.f32.mrb[6].mxu1 }
 0x4a5   : > { %v896_v47 = vadd.f32 %v2770_v27, %v895_v46  ;;  %v1910_v48 = vpop.f32.mrb[7].mxu1 }
 0x4a7   : > { %v899_v49 = vsel %vm659_vm2, %v896_v47, -inf }
 0x4a8   : > { %900 = vmax.xlane.f32.xlu0 %v899_v49 }
 0x4be   : > { %911 = vrot.lane.b32.xlu0 %v2775_v37, %s2395_s30 }
 0x4c2   : > { %1136 = vrot.lane.b32.xlu0 %v2746_v16, %s2396_s23 }
 0x4c6   : > { %1134 = vrot.lane.b32.xlu0 %v2752_v19, %s2396_s23 }
 0x535   : > { %v901_v50 = vpop.xlane.xlu0 %900 }
 0x536   : > { %v902_v51 = vsub.f32 %v896_v47, %v901_v50 }
 0x538   : > { %v903_v52 = vmul.f32 1.442695, %v902_v51 }
 0x539   : > { %v912_v53 = vpop.permute.xlu0 %911 }
 0x53a   : > { %2100 = vpow2.f32 %v903_v52  ;;  %1912 = vmatpush3.msra.mxu1 %v912_v53 }
 0x53b   : > { %1926 = vmatprep.subr.mxu1 %v2394_v1 }
 0x53d   : > { %v1137_v58 = vpop.permute.xlu0 %1136 }
 0x541   : > { %v1135_v60 = vpop.permute.xlu0 %1134 }
 0x544   : > { %v2101_v54 = vpop.eup %2100 }
 0x545   : > { %v905_v55 = vsel %vm659_vm2, %v2101_v54, 0.0 }
 0x546   : > { %906 = vadd.xlane.f32.xlu1 %v905_v55 }
 0x557   : > { %1223 = vrot.lane.b32.xlu1 %v2775_v37, %s2396_s23 }
 0x55b   : > { %1376 = vrot.lane.b32.xlu1 %v2746_v16, %s2397_s12 }
 0x5d3   : > { %v907_v56 = vpop.xlane.xlu1 %906 }
 0x5d4   : > { %2102 = vrcp.f32 %v907_v56 }
 0x5d7   : > { %v1224_v61 = vpop.permute.xlu1 %1223 }
 0x5db   : > { %v1377_v12 = vpop.permute.xlu1 %1376 }
 0x5de   : > { %v2103_v57 = vpop.eup %2102 }
 0x5df   : > { %v909_v59 = vmul.f32 %v2103_v57, %v2101_v54 }
 0x5e1   : > { %1914 = vmatmul.mubr.msk.f32.vlgmr.msra.gmra.mrb[8].mxu1 %vm659_vm2, %v909_v59 }
 0x5e2   : > { %1927 = vmatpush3.xpose.msk.msra.mxu1 %vm659_vm2, %v1137_v58  ;;  %1928 = vmatprep.mubr.msk.f32.mxu1 %vm2393_vm0, %v2394_v1 }
 0x5e3   : > { %1931 = vmatprep.subr.mxu1 %v2394_v1 }
 0x5e5   : > { %1929 = vmatmul.mubr.msk.f32.vlgmr.msra.gmra.mrb[10].mxu1 %vm659_vm2, %v1135_v60 }
 0x5e6   : > { %1932 = vmatpush3.msra.mxu1 %v1224_v61  ;;  %1933 = vmatprep.mubr.msk.f32.mxu1 %vm2393_vm0, %v2394_v1 }
 0x5e7   : > { %1941 = vmatprep.subr.mxu1 %v2394_v1 }
 0x6b4   : > { %v983_v0 = vpop.f32.mrb[8].mxu1 }
 0x6b5   : > { %v1915_v2 = vpop.f32.mrb[9].mxu1  ;;  %1919 = vmatmul.mubr.msk.f32.vlgmr.msra.gmra.mrb[4].mxu0 %vm659_vm2, %v983_v0 }
 0x6b6   : > { %1922 = vmatpush3.msra.mxu0 %v820_v63  ;;  %1923 = vmatprep.mubr.msk.f32.mxu0 %vm2393_vm0, %v2394_v1 }
 0x6b7   : > { %1936 = vmatprep.subr.mxu0 %v2394_v1 }
 0x6b8   : > { %v1208_v3 = vpop.f32.mrb[10].mxu1 }
 0x6b9   : > { %v1209_v4 = vadd.f32 %v2770_v27, %v1208_v3  ;;  %v1930_v5 = vpop.f32.mrb[11].mxu1 }
 0x6bb   : > { %v1212_v6 = vsel %vm659_vm2, %v1209_v4, -inf }
 0x6bc   : > { %1213 = vmax.xlane.f32.xlu0 %v1212_v6 }
 0x6bd   : > { %1924 = vmatmul.mubr.msk.f32.vlgmr.msra.gmra.mrb[4].mxu0 %vm659_vm2, %v816_v44 }
 0x6be   : > { %1938 = vmatprep.mubr.msk.f32.mxu0 %vm2393_vm0, %v2394_v1  ;;  %1937 = vmatpush3.msra.mxu0 %v1299_v17 }
 0x6bf   : > { %1946 = vmatprep.subr.mxu0 %v2394_v1 }
 0x749   : > { %v1214_v7 = vpop.xlane.xlu0 %1213 }
 0x74a   : > { %v1215_v8 = vsub.f32 %v1209_v4, %v1214_v7 }
 0x74c   : > { %v1216_v9 = vmul.f32 1.442695, %v1215_v8 }
 0x74e   : > { %2104 = vpow2.f32 %v1216_v9 }
 0x758   : > { %v2105_v10 = vpop.eup %2104 }
 0x759   : > { %v1218_v11 = vsel %vm659_vm2, %v2105_v10, 0.0 }
 0x75a   : > { %1219 = vadd.xlane.f32.xlu1 %v1218_v11 }
 0x76b   : > { %1374 = vrot.lane.b32.xlu1 %v2752_v19, %s2397_s12 }
 0x7e7   : > { %v1220_v13 = vpop.xlane.xlu1 %1219 }
 0x7e8   : > { %2106 = vrcp.f32 %v1220_v13 }
 0x7eb   : > { %v1375_v16 = vpop.permute.xlu1 %1374 }
 0x7f2   : > { %v2107_v14 = vpop.eup %2106 }
 0x7f3   : > { %v1222_v15 = vmul.f32 %v2107_v14, %v2105_v10 }
 0x7f5   : > { %1934 = vmatmul.mubr.msk.f32.vlgmr.msra.gmra.mrb[12].mxu1 %vm659_vm2, %v1222_v15 }
 0x7f6   : > { %1942 = vmatpush3.xpose.msk.msra.mxu1 %vm659_vm2, %v1377_v12  ;;  %1943 = vmatprep.mubr.msk.f32.mxu1 %vm2393_vm0, %v2394_v1 }
 0x7f9   : > { %1944 = vmatmul.mubr.msk.f32.vlgmr.msra.gmra.mrb[14].mxu1 %vm659_vm2, %v1375_v16 }
 0x8c8   : > { %v1295_v18 = vpop.f32.mrb[12].mxu1 }
 0x8c9   : > { %v1935_v19 = vpop.f32.mrb[13].mxu1  ;;  %1939 = vmatmul.mubr.msk.f32.vlgmr.msra.gmra.mrb[4].mxu0 %vm659_vm2, %v1295_v18 }
 0x8ca   : > { %1948 = vmatprep.mubr.msk.f32.mxu0 %vm2393_vm0, %v2394_v1 }
 0x8cc   : > { %v1448_v20 = vpop.f32.mrb[14].mxu1 }
 0x8cd   : > { %v1449_v21 = vadd.f32 %v2770_v27, %v1448_v20  ;;  %v1945_v22 = vpop.f32.mrb[15].mxu1 }
 0x8cf   : > { %v1452_v23 = vsel %vm659_vm2, %v1449_v21, -inf }
 0x8d0   : > { %1453 = vmax.xlane.f32.xlu0 %v1452_v23 }
 0x8e6   : > { %1463 = vrot.lane.b32.xlu0 %v2775_v37, %s2397_s12 }
 0x95d   : > { %v1454_v24 = vpop.xlane.xlu0 %1453 }
 0x95e   : > { %v1455_v25 = vsub.f32 %v1449_v21, %v1454_v24 }
 0x960   : > { %v1456_v26 = vmul.f32 1.442695, %v1455_v25 }
 0x961   : > { %v1464_v28 = vpop.permute.xlu0 %1463 }
 0x962   : > { %2108 = vpow2.f32 %v1456_v26  ;;  %1947 = vmatpush3.msra.mxu0 %v1464_v28 }
 0x963   : > { %1951 = vmatprep.subr.mxu0 %v2394_v1 }
 0x96c   : > { %v2109_v29 = vpop.eup %2108 }
 0x96d   : > { %v1458_v27 = vsel %vm659_vm2, %v2109_v29, 0.0 }
 0x96e   : > { %1459 = vadd.xlane.f32.xlu1 %v1458_v27 }
 0x9fb   : > { %v1460_v30 = vpop.xlane.xlu1 %1459 }
 0x9fc   : > { %2110 = vrcp.f32 %v1460_v30 }
 0xa06   : > { %v2111_v31 = vpop.eup %2110 }
 0xa07   : > { %v1462_v32 = vmul.f32 %v2111_v31, %v2109_v29 }
 0xa09   : > { %1949 = vmatmul.mubr.msk.f32.vlgmr.msra.gmra.mrb[6].mxu0 %vm659_vm2, %v1462_v32 }
 0xa0a   : > { %1952 = vmatpush3.msra.mxu0 %v1539_v33  ;;  %1953 = vmatprep.mubr.msk.f32.mxu0 %vm2393_vm0, %v2394_v1 }
 0xadc   : > { %v1535_v34 = vpop.f32.mrb[6].mxu0 }
 0xadd   : > { %v1950_v35 = vpop.f32.mrb[7].mxu0  ;;  %1954 = vmatmul.mubr.msk.f32.vlgmr.msra.gmra.mrb[4].mxu0 %vm659_vm2, %v1535_v34 }
 0xbb0   : > { %v1609_v36 = vpop.f32.mrb[4].mxu0 }
 0xbb1   : > { %1614 = vst.msk [vmem:[%s416_s3] sm:$0xff] %vm426_vm1, %v1609_v36  ;;  %v1955_v1 = vpop.f32.mrb[5].mxu0 }
 0xbb2   : > { %2297 = shalt.err (!%p2294_p10)
}
 0xbb3   : > { %s2298_s4 = scalar_lea.hbm %s2844_s7, 128  ;;  %s2302_s21 = scalar_lea.hbm %s2935_s18, 256 }
 0xbb4   : > { %p2299_p1 = scmp.ne.s32.totalorder %s2844_s7, %s2298_s4  ;;  %p2303_p3 = scmp.lt.u32.totalorder %s2844_s7, %s2935_s18 }
 0xbb5   : > { %p2304_p12 = scmp.lt.u32.totalorder %s2302_s21, %s2298_s4  ;;  %p2306_p13 = scmp.lt.u32.totalorder %s2298_s4, %s2844_s7 }
 0xbb6   : > { %p2300_p5 = pnand %p2299_p1, %p2936_p4 }
 0xbb7   : > { %p2305_p6 = por %p2304_p12, %p2303_p3 }
 0xbb8   : > { %p2301_p8 = pneg %p2300_p5 }
 0xbb9   : > { %p2307_p9 = por %p2306_p13, %p2305_p6 }
 0xbbb   : > { %p2308_p0 = pnand %p2307_p9, %p2301_p8 }
 0xbbd   : > { %2311 = shalt.err (!%p2308_p0)
}
 0xbbe   : > { %2000 = dma.vmem_to_hbm [thread:$0]  (%p2936_p4), %s2846_s9, 128, %s2844_s7, %s1616_s8  }
 0xbbf PF: > { %s1642_s23 = sand.u32 1, %s2362_s24   ;;  %p2937_p7 = scmp.ne.s32.totalorder %s2925_s20, 0 }
 0xbc0   : > { %p2938_p11 = scmp.ge.s32.totalorder %s2382_s29, 2  ;;  %s1643_s12 = scalar_lea.sflag [#allocation4], %s1642_s23 }
 0xbc2   : > { %p2023_p2 = pnand %p2938_p11, %p2937_p7 }
 0xbc4   : > { %2357 = dma.done.wait (!%p2023_p2), %s1643_s12, 128  }
 0xbc5   : > { %2359 = vsyncadd (!%p2023_p2), %s1643_s12, 4294967168  ;;  %s28_s29 = sadd.s32 1, %s2382_s29   ;;  %s2939_s17 = sld [smem:[#allocation20_spill]] }
 0xbc6   : > { %p25_p10 = scmp.ge.s32.totalorder %s28_s29, 4   ;;  %s2940_s24 = smov %s2366_s25 }
 0xbc7   : > { %s2941_s25 = smov %s2370_s26  ;;  %s2942_s26 = smov %s2623_s19 }
 0xbc8   : > { %s2943_s27 = smov %s2378_s28  ;;  %27 = sbr.rel (!%p25_p10) target bundleno = 16 (0x10), region = 125 }
 0xbcb   : > { %s2944_s28 = smov %s2939_s17 }
 0xbcf   :  { %1648 = vsyncpa [#allocation3], 1 }
 0xbd0   :  { %1650 = vsyncpa [#allocation3 + $0x1], 1 }
 0xbd1   :  { %1651 = vsyncpa [#allocation6], 1 }
 0xbd2   :  { %1653 = vsyncpa [#allocation6 + $0x1], 1 }
 0xbd3   :  { %1654 = vsyncpa [#allocation9], 1 }
 0xbd4   :  { %1655 = vsyncpa [#allocation12], 1 }
 0xbd5   :  { %1656 = vsyncpa [#allocation4], 1 }
 0xbd6   :  { %1658 = vsyncpa [#allocation4 + $0x1], 1 }

</bundles_post_ra>
